<compile_context>
chip_gen: v5e
topology: v5e:2x2
jax: 0.10.0
libtpu: 0.0.40
codegen_flags: <defaults>
</compile_context>

<pallas_src>
import functools

import jax
import jax.numpy as jnp
from jax import lax
from jax.experimental import pallas as pl
from jax.experimental.pallas import tpu as pltpu

N_EMBD = 64 * 4      # 256, matches the PyTorch module's n_embd
BLOCK_SIZE = 256     # causal mask buffer size in the reference (only tril[:T,:T] used)


def _head_kernel(x_ref, wqkv_ref, o_ref):
    """One grid step == BB batch elements.

    x_ref    : (BB, T, C)      VMEM
    wqkv_ref : (C, 3*Hp)       VMEM (shared across grid steps; q|k|v, scale
                               already folded into the q block, padded to Hp)
    o_ref    : (BB, T, Hp)     VMEM (lane-dense; cols >= H are zero)
    """
    bb, t, c = x_ref.shape
    hp = o_ref.shape[-1]

    # Fused QKV projection: one MXU pass with N = 3*Hp.
    x2d = x_ref[...].reshape(bb * t, c)                       # merge leading dims (free)
    qkv = jnp.dot(x2d, wqkv_ref[...],
                  preferred_element_type=jnp.float32)         # (BB*T, 3*Hp) f32
    qkv = qkv.reshape(bb, t, 3 * hp)

    # Lane-aligned splits (multiples of 128).
    q = qkv[:, :, 0 * hp:1 * hp]                              # (BB, T, Hp)
    k = qkv[:, :, 1 * hp:2 * hp]
    v = qkv[:, :, 2 * hp:3 * hp]

    # Attention logits; scale already folded into the query weights.
    # Batched dot_general contracting the head dim of both operands — no k.T.
    wei = jnp.einsum('bqh,bkh->bqk', q, k,
                     preferred_element_type=jnp.float32)      # (BB, T, T)

    # Causal mask (lower-triangular keep). Diagonal is always unmasked, so
    # -inf is safe for the stable softmax below.
    row = lax.broadcasted_iota(jnp.int32, (t, t), 0)
    col = lax.broadcasted_iota(jnp.int32, (t, t), 1)
    wei = jnp.where((col <= row)[None], wei, -jnp.inf)

    # Numerically stable softmax over the last dim.
    m = jnp.max(wei, axis=-1, keepdims=True)
    p = jnp.exp(wei - m)
    denom = jnp.sum(p, axis=-1, keepdims=True)
    wei = p * pl.reciprocal(denom, approx=False)              # exact: keeps 1e-4 tol

    # dropout: identity (eval mode)

    out = jnp.einsum('bqk,bkh->bqh', wei, v,
                     preferred_element_type=jnp.float32)      # (BB, T, Hp)
    o_ref[...] = out.astype(o_ref.dtype)


def _pick_bb(B, T, C, Hp, x_itemsize):
    """Batch elements per grid step: amortize per-step overhead, but keep
    >= 2 parallel grid steps (v7x: 2 TensorCores) and stay well under the
    v7x scoped-VMEM budget (double-buffered input + output tiles)."""
    per_batch = 2 * T * (C * x_itemsize + Hp * 4)   # double-buffered in + out bytes
    cap = max(1, (16 << 20) // per_batch)           # conservative (v7x-safe)
    target = max(1, B // 2) if B >= 2 else 1        # leave >= 2 grid steps
    bb = max(1, min(cap, target))
    while B % bb:                                   # need an exact divisor
        bb -= 1
    return bb


@jax.jit
def head_forward(x, w_key, w_query, w_value):
    """x: (B, T, C); w_*: (head_size, C) as stored by nn.Linear(bias=False)."""
    B, T, C = x.shape
    H = w_key.shape[0]
    Hp = ((H + 127) // 128) * 128                   # lane-dense head dim

    # nn.Linear computes x @ W^T; pre-transpose, fold the C**-0.5 scale into
    # the query weight, zero-pad head dim to Hp, and fuse q|k|v into one weight.
    scale = jnp.asarray(C ** (-0.5), dtype=w_query.dtype)   # note: C, not head_size (as in reference)

    def prep(w):                                    # (H, C) -> (C, Hp)
        wt = w.T
        if Hp != H:
            wt = jnp.pad(wt, ((0, 0), (0, Hp - H)))
        return wt

    wqkv = jnp.concatenate(
        [prep(w_query * scale), prep(w_key), prep(w_value)], axis=1)   # (C, 3*Hp)

    BB = _pick_bb(B, T, C, Hp, x.dtype.itemsize)
    grid = (B // BB,)

    flops = 2 * B * T * C * (3 * Hp) + 2 * (2 * B * T * T * Hp)
    bytes_accessed = (x.size * x.dtype.itemsize
                      + wqkv.size * wqkv.dtype.itemsize
                      + B * T * Hp * x.dtype.itemsize)

    out_padded = pl.pallas_call(
        _head_kernel,
        out_shape=jax.ShapeDtypeStruct((B, T, Hp), x.dtype),
        grid_spec=pltpu.PrefetchScalarGridSpec(
            num_scalar_prefetch=0,
            grid=grid,
            in_specs=[
                pl.BlockSpec((BB, T, C), lambda b: (b, 0, 0)),
                pl.BlockSpec((C, 3 * Hp), lambda b: (0, 0)),
            ],
            out_specs=pl.BlockSpec((BB, T, Hp), lambda b: (b, 0, 0)),
        ),
        compiler_params=pltpu.CompilerParams(
            dimension_semantics=("parallel",),
        ),
        cost_estimate=pl.CostEstimate(
            flops=int(flops),
            transcendentals=int(B * T * T),
            bytes_accessed=int(bytes_accessed),
        ),
    )(x, wqkv)

    return out_padded[:, :, :H]                     # drop the zero padding


def reference_forward(x, w_key, w_query, w_value):
    """Pure-JAX reference mirroring the PyTorch forward (eval mode)."""
    B, T, C = x.shape
    k = x @ w_key.T
    q = x @ w_query.T
    v = x @ w_value.T
    wei = (q @ jnp.swapaxes(k, -2, -1)) * (C ** -0.5)
    tril = jnp.tril(jnp.ones((T, T), dtype=x.dtype))
    wei = jnp.where(tril == 0, -jnp.inf, wei)
    wei = jax.nn.softmax(wei, axis=-1)
    return wei @ v


if __name__ == "__main__":
    key = jax.random.PRNGKey(0)
    B, T, C = 2, 8, N_EMBD     # C is fixed to n_embd = 256 by the module
    head_size = 32

    k_x, k_k, k_q, k_v = jax.random.split(key, 4)
    x = jax.random.normal(k_x, (B, T, C), dtype=jnp.float32)
    # nn.Linear(n_embd, head_size, bias=False) -> weight shape (head_size, n_embd)
    bound = 1.0 / (C ** 0.5)
    w_key = jax.random.uniform(k_k, (head_size, C), jnp.float32, -bound, bound)
    w_query = jax.random.uniform(k_q, (head_size, C), jnp.float32, -bound, bound)
    w_value = jax.random.uniform(k_v, (head_size, C), jnp.float32, -bound, bound)

    out = head_forward(x, w_key, w_query, w_value)
    out = jax.block_until_ready(out)

    ref = reference_forward(x, w_key, w_query, w_value)
    assert out.shape == (B, T, head_size), out.shape
    assert jnp.allclose(out, ref, atol=1e-4, rtol=1e-4), float(jnp.max(jnp.abs(out - ref)))

    print("KERNEL_OK")
</pallas_src>

<mosaic_0001>
module attributes {stable_mosaic.version = 11 : i64} {
  func.func @_head_kernel(%arg0: i32, %arg1: memref<1x8x256xf32, #tpu.memory_space<vmem>>, %arg2: memref<256x384xf32, #tpu.memory_space<vmem>>, %arg3: memref<1x8x128xf32, #tpu.memory_space<vmem>>) attributes {dimension_semantics = [#tpu.dimension_semantics<parallel>], iteration_bounds = array<i64: 2>, scalar_prefetch = 0 : i64, scratch_operands = 0 : i64, tpu.core_type = #tpu.core_type<tc>, window_params = [{transform_indices = @transform_0, window_bounds = array<i64: 1, 8, 256>}, {pipeline_mode = #tpu.pipeline_mode<synchronous>, transform_indices = @transform_1, window_bounds = array<i64: 256, 384>}, {transform_indices = @transform_2, window_bounds = array<i64: 1, 8, 128>}]} {
    %c0 = arith.constant 0 : index
    %c0_0 = arith.constant 0 : index
    %c0_1 = arith.constant 0 : index
    %0 = vector.load %arg1[%c0, %c0_0, %c0_1] : memref<1x8x256xf32, #tpu.memory_space<vmem>>, vector<1x8x256xf32>
    %1 = vector.shape_cast %0 : vector<1x8x256xf32> to vector<8x256xf32>
    %c0_2 = arith.constant 0 : index
    %c0_3 = arith.constant 0 : index
    %2 = vector.load %arg2[%c0_2, %c0_3] : memref<256x384xf32, #tpu.memory_space<vmem>>, vector<256x384xf32>
    %cst = arith.constant dense<0.000000e+00> : vector<8x384xf32>
    %3 = tpu.matmul %1, %2, %cst {dimension_numbers = #tpu.dot_dimension_numbers<[1], [0], [0], [1], [0, 0, 1, 1], [], []>} : vector<8x256xf32>, vector<256x384xf32>, vector<8x384xf32> -> vector<8x384xf32>
    %4 = vector.shape_cast %3 : vector<8x384xf32> to vector<1x8x384xf32>
    %5 = vector.extract_strided_slice %4 {offsets = [0, 0, 0], sizes = [1, 8, 128], strides = [1, 1, 1]} : vector<1x8x384xf32> to vector<1x8x128xf32>
    %6 = vector.extract_strided_slice %4 {offsets = [0, 0, 128], sizes = [1, 8, 128], strides = [1, 1, 1]} : vector<1x8x384xf32> to vector<1x8x128xf32>
    %7 = vector.extract_strided_slice %4 {offsets = [0, 0, 256], sizes = [1, 8, 128], strides = [1, 1, 1]} : vector<1x8x384xf32> to vector<1x8x128xf32>
    "tpu.trace_start"() <{level = 10 : i32, message = "bqh,bkh->bqk"}> : () -> ()
    %cst_4 = arith.constant dense<0.000000e+00> : vector<1x8x8xf32>
    %8 = tpu.matmul %5, %6, %cst_4 {dimension_numbers = #tpu.dot_dimension_numbers<[2], [2], [1], [1], [0, 0, 0, 1, 1, 1], [0], [0]>} : vector<1x8x128xf32>, vector<1x8x128xf32>, vector<1x8x8xf32> -> vector<1x8x8xf32>
    "tpu.trace_stop"() : () -> ()
    %9 = tpu.iota {dimensions = array<i32: 0>} : vector<8x8xi32>
    %10 = tpu.iota {dimensions = array<i32: 1>} : vector<8x8xi32>
    %11 = arith.cmpi sle, %10, %9 : vector<8x8xi32>
    %12 = vector.shape_cast %11 : vector<8x8xi1> to vector<1x8x8xi1>
    %cst_5 = arith.constant 0xFF800000 : f32
    %13 = vector.broadcast %cst_5 : f32 to vector<1x8x8xf32>
    %14 = arith.select %12, %8, %13 : vector<1x8x8xi1>, vector<1x8x8xf32>
    %cst_6 = arith.constant dense<0xFF800000> : vector<1x8xf32>
    %15 = vector.multi_reduction <maximumf>, %14, %cst_6 [2] : vector<1x8x8xf32> to vector<1x8xf32>
    %16 = vector.shape_cast %15 : vector<1x8xf32> to vector<1x8x1xf32>
    %17 = vector.broadcast %16 : vector<1x8x1xf32> to vector<1x8x8xf32>
    %18 = arith.subf %14, %17 : vector<1x8x8xf32>
    %19 = math.exp %18 : vector<1x8x8xf32>
    %cst_7 = arith.constant dense<0.000000e+00> : vector<1x8xf32>
    %20 = vector.multi_reduction <add>, %19, %cst_7 [2] : vector<1x8x8xf32> to vector<1x8xf32>
    %21 = vector.shape_cast %20 : vector<1x8xf32> to vector<1x8x1xf32>
    %22 = tpu.reciprocal %21 : vector<1x8x1xf32> -> vector<1x8x1xf32>
    %23 = vector.broadcast %22 : vector<1x8x1xf32> to vector<1x8x8xf32>
    %24 = arith.mulf %19, %23 : vector<1x8x8xf32>
    "tpu.trace_start"() <{level = 10 : i32, message = "bqk,bkh->bqh"}> : () -> ()
    %cst_8 = arith.constant dense<0.000000e+00> : vector<1x8x128xf32>
    %25 = tpu.matmul %24, %7, %cst_8 {dimension_numbers = #tpu.dot_dimension_numbers<[2], [1], [1], [2], [0, 0, 0, 1, 1, 2], [0], [0]>} : vector<1x8x8xf32>, vector<1x8x128xf32>, vector<1x8x128xf32> -> vector<1x8x128xf32>
    "tpu.trace_stop"() : () -> ()
    %c0_9 = arith.constant 0 : index
    %c0_10 = arith.constant 0 : index
    %c0_11 = arith.constant 0 : index
    %26 = vector.load %arg3[%c0_9, %c0_10, %c0_11] : memref<1x8x128xf32, #tpu.memory_space<vmem>>, vector<1x8x128xf32>
    tpu.vector_store %arg3[%c0_9, %c0_10, %c0_11], %25 {strides = array<i32>} : memref<1x8x128xf32, #tpu.memory_space<vmem>>, vector<1x8x128xf32>,
    return
  }
  func.func @transform_0(%arg0: i32) -> (i32, i32, i32) {
    %c0_i32 = arith.constant 0 : i32
    %c0_i32_0 = arith.constant 0 : i32
    %c0_i32_1 = arith.constant 0 : i32
    return %arg0, %c0_i32, %c0_i32_0 : i32, i32, i32
  }
  func.func @transform_1(%arg0: i32) -> (i32, i32) {
    %c0_i32 = arith.constant 0 : i32
    %c0_i32_0 = arith.constant 0 : i32
    %c0_i32_1 = arith.constant 0 : i32
    return %c0_i32, %c0_i32_0 : i32, i32
  }
  func.func @transform_2(%arg0: i32) -> (i32, i32, i32) {
    %c0_i32 = arith.constant 0 : i32
    %c0_i32_0 = arith.constant 0 : i32
    %c0_i32_1 = arith.constant 0 : i32
    return %arg0, %c0_i32, %c0_i32_0 : i32, i32, i32
  }
}

</mosaic_0001>

<bundles_post_ra>
// kernel: head_forward.1
= control target key start
LH: loop header
LB: loop body
LE: loop exit
PB: predicated region body
PF: predicated region fallthrough
CT: control target
= control target key end

     0   :  { %7 = vsyncpa [#allocation3], 0  ;;  %s1036_s0 = inlined_call_operand.vmem [shape: f32[2,8,256], index: 0, kind: input, shape index: {}]   ;;  %s1037_s1 = inlined_call_operand.vmem [shape: f32[256,384], index: 1, kind: input, shape index: {}]   ;;  %s1038_s2 = inlined_call_operand.hbm [shape: f32[2,8,128], index: 2, kind: output, shape index: {}]  }
   0x1   :  { %9 = vsyncpa [#allocation3 + $0x1], 0  ;;  %s645_s9 = smov 0   ;;  %s647_s10 = smov 0  }
   0x2   :  { %s649_s11 = smov 0   ;;  %s651_s12 = smov 0  }
   0x3 LB: > { %s666_s13 = sadd.s32 4294967295, %s628_s12   ;;  %s510_s14 = sadd.s32 4294967294, %s628_s12   ;;  %s628_s12 = sphi %s651_s12, %s1044_s12   ;;  %s624_s11 = sphi %s649_s11, %s1043_s11   ;;  %s620_s10 = sphi %s647_s10, %s1042_s10   ;;  %s616_s9 = sphi %s645_s9, %s1041_s9  }
   0x4   : > { %s670_s15 = sadd.s32 1, %s628_s12   ;;  %s69_s16 = sadd.s32 1, %s624_s11 }
   0x5   : > { %s66_s17 = ssub.s32 %s628_s12, %s670_s15  ;;  %p79_p0 = scmp.ne.s32.totalorder %s624_s11, %s620_s10 }
   0x6   : > { %p67_p1 = scmp.eq.s32.totalorder %s66_s17, 0  ;;  %p80_p2 = scmp.eq.s32.totalorder %s666_s13, 1 }
   0x7   : > { %p85_p3 = scmp.ne.s32.totalorder %s620_s10, %s616_s9  ;;  %p86_p4 = scmp.eq.s32.totalorder %s510_s14, 1 }
   0x8   : > { %s681_s18 = scalar_select %p67_p1, %s624_s11, %s69_s16  }
   0x9   : > { %p683_p5 = por %p80_p2, %p79_p0  ;;  %p687_p6 = por %p86_p4, %p85_p3 }
   0xa   : > { %p513_p7 = scmp.ge.s32.totalorder %s628_s12, 1  ;;  %p115_p8 = scmp.lt.s32.totalorder %s628_s12, 3 }
   0xc   : > { %p116_p9 = pnand %p513_p7, %p115_p8 }
   0xd   : > { %p137_p10 = scmp.lt.s32.totalorder (!%p116_p9), %s666_s13, 1  ;;  %s134_s30 = sand.u32 (!%p116_p9), 1, %s620_s10  }
   0xe   : > { %119 = sbr.rel (%p116_p9) target bundleno = 721 (0x2d1), region = 28  ;;  %s514_s3 = sshll.u32 (!%p116_p9), %s134_s30, 3 }
   0xf   : > { %s519_s4 = sshll.u32 (!%p116_p9), %s666_s13, 3  ;;  %s136_s7 = scalar_lea.vmem (!%p116_p9), [#allocation2], %s514_s3 }
  0x10   : > { %s446_s6 = scalar_lea.hbm (!%p116_p9), %s1038_s2, %s519_s4  ;;  %s448_s8 = sshll.u32 (!%p116_p9), %s136_s7, 4  ;;  %s449_s8 = int_to_ptr.vmem [resolvable:$true] %s448_s8 }
  0x11   : > { %s436_s14 = scalar_lea.sflag (!%p116_p9), [#allocation3], %s134_s30  ;;  %s586_s22 = scalar_lea.hbm (!%p116_p9), %s1038_s2, 16 }
  0x13   : > { %v190_v0 = vld [vmem:[%s1037_s1 + $0x170] sm:$0xff]  ;;  %v187_v2 = vld [vmem:[%s1037_s1 + $0x158] sm:$0xff]  ;;  %v184_v4 = vld [vmem:[%s1037_s1 + $0x140] sm:$0xff]  ;;  %s823_s29 = scalar_select %p137_p10, %s666_s13, 1  ;;  %vm386_vm1 = vcmask 64512  }
  0x14   : > { %v238_v1 = vld [vmem:[%s1037_s1 + $0x2f0] sm:$0xff]  ;;  %280 = vmatpush.msra.mxu2 %v190_v0  ;;  %v235_v3 = vld [vmem:[%s1037_s1 + $0x2d8] sm:$0xff]  ;;  %v232_v5 = vld [vmem:[%s1037_s1 + $0x2c0] sm:$0xff] }
  0x15   : > { %300 = vmatpush.msra.mxu3 %v238_v1  ;;  %v189_v6 = vld [vmem:[%s1037_s1 + $0x168] sm:$0xff]  ;;  %v186_v10 = vld [vmem:[%s1037_s1 + $0x150] sm:$0xff]  ;;  %v183_v14 = vld [vmem:[%s1037_s1 + $0x138] sm:$0xff]  ;;  %s522_s27 = sshll.u32 %s823_s29, 4  ;;  %s450_s29 = sshll.u32 %s446_s6, 4  ;;  %s451_s29 = int_to_ptr.hbm [resolvable:$true] %s450_s29 }
  0x16   : > { %281 = vmatpush.msra.mxu2 %v187_v2  ;;  %v237_v7 = vld [vmem:[%s1037_s1 + $0x2e8] sm:$0xff]  ;;  %240 = vmatpush.msra.mxu0 %v189_v6  ;;  %v178_v11 = vld [vmem:[%s1037_s1 + $0x110] sm:$0xff]  ;;  %v231_v15 = vld [vmem:[%s1037_s1 + $0x2b8] sm:$0xff]  ;;  %s141_s23 = scalar_lea.vmem %s1036_s0, %s522_s27  ;;  %s580_s16 = sshra.s32 %s451_s29, 4  ;;  %s581_s16 = int_to_ptr.hbm [resolvable:$true] %s580_s16 }
  0x17   : > { %301 = vmatpush.msra.mxu3 %v235_v3  ;;  %v181_v8 = vld [vmem:[%s1037_s1 + $0x128] sm:$0xff]  ;;  %260 = vmatpush.msra.mxu1 %v237_v7  ;;  %v234_v12 = vld [vmem:[%s1037_s1 + $0x2d0] sm:$0xff]  ;;  %v180_v16 = vld [vmem:[%s1037_s1 + $0x120] sm:$0xff]  ;;  %s582_s17 = scalar_lea.hbm %s581_s16, 8  ;;  %p587_p0 = scmp.lt.s32.totalorder %s581_s16, %s1038_s2 }
  0x18   : > { %v229_v9 = vld [vmem:[%s1037_s1 + $0x2a8] sm:$0xff]  ;;  %282 = vmatpush.msra.mxu2 %v184_v4  ;;  %v226_v13 = vld [vmem:[%s1037_s1 + $0x290] sm:$0xff]  ;;  %241 = vmatpush.msra.mxu0 %v186_v10  ;;  %v228_v17 = vld [vmem:[%s1037_s1 + $0x2a0] sm:$0xff]  ;;  %p583_p11 = scmp.ne.s32.totalorder %s581_s16, %s582_s17  ;;  %p588_p1 = scmp.lt.s32.totalorder %s586_s22, %s582_s17 }
  0x19   : > { %302 = vmatpush.msra.mxu3 %v232_v5  ;;  %261 = vmatpush.msra.mxu1 %v234_v12  ;;  %v175_v18 = vld [vmem:[%s1037_s1 + $0xf8] sm:$0xff]  ;;  %v177_v20 = vld [vmem:[%s1037_s1 + $0x108] sm:$0xff]  ;;  %v172_v22 = vld [vmem:[%s1037_s1 + $0xe0] sm:$0xff] }
  0x1a   : > { %283 = vmatpush.msra.mxu2 %v181_v8  ;;  %v223_v19 = vld [vmem:[%s1037_s1 + $0x278] sm:$0xff]  ;;  %242 = vmatpush.msra.mxu0 %v183_v14  ;;  %v225_v21 = vld [vmem:[%s1037_s1 + $0x288] sm:$0xff]  ;;  %v220_v23 = vld [vmem:[%s1037_s1 + $0x260] sm:$0xff]  ;;  %p584_p12 = pnand %p583_p11, %p683_p5  ;;  %p589_p2 = por %p588_p1, %p587_p0 }
  0x1b   : > { %303 = vmatpush.msra.mxu3 %v229_v9  ;;  %262 = vmatpush.msra.mxu1 %v231_v15  ;;  %v174_v24 = vld [vmem:[%s1037_s1 + $0xf0] sm:$0xff]  ;;  %v169_v26 = vld [vmem:[%s1037_s1 + $0xc8] sm:$0xff]  ;;  %v171_v28 = vld [vmem:[%s1037_s1 + $0xd8] sm:$0xff] }
  0x1c   : > { %284 = vmatpush.msra.mxu2 %v178_v11  ;;  %243 = vmatpush.msra.mxu0 %v180_v16  ;;  %v222_v25 = vld [vmem:[%s1037_s1 + $0x270] sm:$0xff]  ;;  %v217_v27 = vld [vmem:[%s1037_s1 + $0x248] sm:$0xff]  ;;  %v219_v29 = vld [vmem:[%s1037_s1 + $0x258] sm:$0xff]  ;;  %p585_p13 = pneg %p584_p12 }
  0x1d   : > { %304 = vmatpush.msra.mxu3 %v226_v13  ;;  %263 = vmatpush.msra.mxu1 %v228_v17  ;;  %v166_v30 = vld [vmem:[%s1037_s1 + $0xb0] sm:$0xff]  ;;  %v168_v32 = vld [vmem:[%s1037_s1 + $0xc0] sm:$0xff]  ;;  %v163_v34 = vld [vmem:[%s1037_s1 + $0x98] sm:$0xff] }
  0x1e   : > { %285 = vmatpush.msra.mxu2 %v175_v18  ;;  %244 = vmatpush.msra.mxu0 %v177_v20  ;;  %v214_v31 = vld [vmem:[%s1037_s1 + $0x230] sm:$0xff]  ;;  %v216_v33 = vld [vmem:[%s1037_s1 + $0x240] sm:$0xff]  ;;  %v211_v35 = vld [vmem:[%s1037_s1 + $0x218] sm:$0xff]  ;;  %p590_p3 = pnand %p589_p2, %p585_p13 }
  0x1f   : > { %305 = vmatpush.msra.mxu3 %v223_v19  ;;  %264 = vmatpush.msra.mxu1 %v225_v21  ;;  %v165_v36 = vld [vmem:[%s1037_s1 + $0xa8] sm:$0xff]  ;;  %v160_v38 = vld [vmem:[%s1037_s1 + $0x80] sm:$0xff]  ;;  %v162_v40 = vld [vmem:[%s1037_s1 + $0x90] sm:$0xff] }
  0x20   : > { %286 = vmatpush.msra.mxu2 %v172_v22  ;;  %245 = vmatpush.msra.mxu0 %v174_v24  ;;  %v213_v37 = vld [vmem:[%s1037_s1 + $0x228] sm:$0xff]  ;;  %v208_v39 = vld [vmem:[%s1037_s1 + $0x200] sm:$0xff]  ;;  %v210_v41 = vld [vmem:[%s1037_s1 + $0x210] sm:$0xff]  ;;  %v380_v24 = vlaneseq }
  0x21   : > { %306 = vmatpush.msra.mxu3 %v220_v23  ;;  %265 = vmatpush.msra.mxu1 %v222_v25  ;;  %v157_v42 = vld [vmem:[%s1037_s1 + $0x68] sm:$0xff]  ;;  %v159_v44 = vld [vmem:[%s1037_s1 + $0x78] sm:$0xff]  ;;  %v154_v46 = vld [vmem:[%s1037_s1 + $0x50] sm:$0xff] }
  0x22   : > { %287 = vmatpush.msra.mxu2 %v169_v26  ;;  %246 = vmatpush.msra.mxu0 %v171_v28  ;;  %v205_v43 = vld [vmem:[%s1037_s1 + $0x1e8] sm:$0xff]  ;;  %v207_v45 = vld [vmem:[%s1037_s1 + $0x1f8] sm:$0xff]  ;;  %v202_v47 = vld [vmem:[%s1037_s1 + $0x1d0] sm:$0xff]  ;;  %v381_v25 = vshrl.u32 %v380_v24, 7  ;;  %v383_v26 = vand.u32 127, %v380_v24 }
  0x23   : > { %307 = vmatpush.msra.mxu3 %v217_v27  ;;  %266 = vmatpush.msra.mxu1 %v219_v29  ;;  %v156_v48 = vld [vmem:[%s1037_s1 + $0x60] sm:$0xff]  ;;  %v151_v50 = vld [vmem:[%s1037_s1 + $0x38] sm:$0xff]  ;;  %v153_v52 = vld [vmem:[%s1037_s1 + $0x48] sm:$0xff] }
  0x24   : > { %288 = vmatpush.msra.mxu2 %v166_v30  ;;  %247 = vmatpush.msra.mxu0 %v168_v32  ;;  %v204_v49 = vld [vmem:[%s1037_s1 + $0x1e0] sm:$0xff]  ;;  %v199_v51 = vld [vmem:[%s1037_s1 + $0x1b8] sm:$0xff]  ;;  %v201_v53 = vld [vmem:[%s1037_s1 + $0x1c8] sm:$0xff]  ;;  %vm384_vm0 = vcmp.le.s32.totalorder %v383_v26, %v381_v25 }
  0x25   : > { %308 = vmatpush.msra.mxu3 %v214_v31  ;;  %267 = vmatpush.msra.mxu1 %v216_v33  ;;  %v148_v54 = vld [vmem:[%s1037_s1 + $0x20] sm:$0xff]  ;;  %v150_v56 = vld [vmem:[%s1037_s1 + $0x30] sm:$0xff]  ;;  %v145_v58 = vld [vmem:[%s1037_s1 + $0x8] sm:$0xff] }
  0x26   : > { %289 = vmatpush.msra.mxu2 %v163_v34  ;;  %248 = vmatpush.msra.mxu0 %v165_v36  ;;  %v196_v55 = vld [vmem:[%s1037_s1 + $0x1a0] sm:$0xff]  ;;  %v198_v57 = vld [vmem:[%s1037_s1 + $0x1b0] sm:$0xff]  ;;  %v193_v59 = vld [vmem:[%s1037_s1 + $0x188] sm:$0xff] }
  0x27   : > { %309 = vmatpush.msra.mxu3 %v211_v35  ;;  %268 = vmatpush.msra.mxu1 %v213_v37  ;;  %v883_v60 = vld [vmem:[%s141_s23] sm:$0xff]  ;;  %v885_v61 = vld [vmem:[%s141_s23 + $0x8] sm:$0xff]  ;;  %v147_v62 = vld [vmem:[%s1037_s1 + $0x18] sm:$0xff] }
  0x28   : > { %290 = vmatpush.msra.mxu2 %v160_v38  ;;  %249 = vmatpush.msra.mxu0 %v162_v40  ;;  %v195_v63 = vld [vmem:[%s1037_s1 + $0x198] sm:$0xff]  ;;  %v144_v0 = vld [vmem:[%s1037_s1] sm:$0xff]  ;;  %v185_v12 = vld [vmem:[%s1037_s1 + $0x148] sm:$0xff] }
  0x29   : > { %310 = vmatpush.msra.mxu3 %v208_v39  ;;  %269 = vmatpush.msra.mxu1 %v210_v41  ;;  %v192_v1 = vld [vmem:[%s1037_s1 + $0x180] sm:$0xff]  ;;  %v191_v8 = vld [vmem:[%s1037_s1 + $0x178] sm:$0xff]  ;;  %v233_v13 = vld [vmem:[%s1037_s1 + $0x2c8] sm:$0xff] }
  0x2a   : > { %291 = vmatpush.msra.mxu2 %v157_v42  ;;  %250 = vmatpush.msra.mxu0 %v159_v44  ;;  %v239_v9 = vld [vmem:[%s1037_s1 + $0x2f8] sm:$0xff]  ;;  %v188_v10 = vld [vmem:[%s1037_s1 + $0x160] sm:$0xff]  ;;  %v182_v14 = vld [vmem:[%s1037_s1 + $0x130] sm:$0xff] }
  0x2b   : > { %311 = vmatpush.msra.mxu3 %v205_v43  ;;  %270 = vmatpush.msra.mxu1 %v207_v45  ;;  %v236_v11 = vld [vmem:[%s1037_s1 + $0x2e0] sm:$0xff]  ;;  %v230_v15 = vld [vmem:[%s1037_s1 + $0x2b0] sm:$0xff]  ;;  %v179_v16 = vld [vmem:[%s1037_s1 + $0x118] sm:$0xff] }
  0x2c   : > { %292 = vmatpush.msra.mxu2 %v154_v46  ;;  %251 = vmatpush.msra.mxu0 %v156_v48  ;;  %v227_v17 = vld [vmem:[%s1037_s1 + $0x298] sm:$0xff]  ;;  %v176_v18 = vld [vmem:[%s1037_s1 + $0x100] sm:$0xff]  ;;  %v173_v20 = vld [vmem:[%s1037_s1 + $0xe8] sm:$0xff] }
  0x2d   : > { %312 = vmatpush.msra.mxu3 %v202_v47  ;;  %271 = vmatpush.msra.mxu1 %v204_v49  ;;  %v224_v19 = vld [vmem:[%s1037_s1 + $0x280] sm:$0xff]  ;;  %v221_v21 = vld [vmem:[%s1037_s1 + $0x268] sm:$0xff]  ;;  %v170_v22 = vld [vmem:[%s1037_s1 + $0xd0] sm:$0xff] }
  0x2e   : > { %293 = vmatpush.msra.mxu2 %v151_v50  ;;  %252 = vmatpush.msra.mxu0 %v153_v52  ;;  %v218_v23 = vld [vmem:[%s1037_s1 + $0x250] sm:$0xff]  ;;  %v167_v30 = vld [vmem:[%s1037_s1 + $0xb8] sm:$0xff]  ;;  %v164_v32 = vld [vmem:[%s1037_s1 + $0xa0] sm:$0xff] }
  0x2f   : > { %313 = vmatpush.msra.mxu3 %v199_v51  ;;  %272 = vmatpush.msra.mxu1 %v201_v53  ;;  %v215_v31 = vld [vmem:[%s1037_s1 + $0x238] sm:$0xff]  ;;  %v212_v33 = vld [vmem:[%s1037_s1 + $0x220] sm:$0xff]  ;;  %v161_v34 = vld [vmem:[%s1037_s1 + $0x88] sm:$0xff] }
  0x30   : > { %294 = vmatpush.msra.mxu2 %v148_v54  ;;  %253 = vmatpush.msra.mxu0 %v150_v56  ;;  %v209_v35 = vld [vmem:[%s1037_s1 + $0x208] sm:$0xff]  ;;  %v158_v36 = vld [vmem:[%s1037_s1 + $0x70] sm:$0xff]  ;;  %v155_v38 = vld [vmem:[%s1037_s1 + $0x58] sm:$0xff] }
  0x31   : > { %314 = vmatpush.msra.mxu3 %v196_v55  ;;  %273 = vmatpush.msra.mxu1 %v198_v57  ;;  %v206_v37 = vld [vmem:[%s1037_s1 + $0x1f0] sm:$0xff]  ;;  %v203_v39 = vld [vmem:[%s1037_s1 + $0x1d8] sm:$0xff]  ;;  %v152_v40 = vld [vmem:[%s1037_s1 + $0x40] sm:$0xff] }
  0x32   : > { %295 = vmatpush.msra.mxu2 %v145_v58  ;;  %254 = vmatpush.msra.mxu0 %v147_v62  ;;  %v200_v41 = vld [vmem:[%s1037_s1 + $0x1c0] sm:$0xff]  ;;  %v149_v42 = vld [vmem:[%s1037_s1 + $0x28] sm:$0xff]  ;;  %v146_v44 = vld [vmem:[%s1037_s1 + $0x10] sm:$0xff] }
  0x33   : > { %315 = vmatpush.msra.mxu3 %v193_v59  ;;  %296 = vmatmul.f32.vlgmr.msra.gmra.mxu2 %v883_v60  ;;  %v197_v43 = vld [vmem:[%s1037_s1 + $0x1a8] sm:$0xff]  ;;  %v194_v45 = vld [vmem:[%s1037_s1 + $0x190] sm:$0xff] }
  0x34   : > { %316 = vmatmul.f32.vlgmr.msra.gmra.mxu3 %v885_v61  ;;  %274 = vmatpush.msra.mxu1 %v195_v63 }
  0x35   : > { %255 = vmatpush.msra.mxu0 %v144_v0 }
  0x36   : > { %275 = vmatpush.msra.mxu1 %v192_v1  ;;  %256 = vmatmul.f32.vlgmr.msra.gmra.mxu0 %v883_v60 }
  0x37   : > { %276 = vmatmul.f32.vlgmr.msra.gmra.mxu1 %v885_v61  ;;  %320 = vmatpush.msrb.mxu0 %v191_v8 }
  0x38   : > { %340 = vmatpush.msrb.mxu1 %v239_v9 }
  0x39   : > { %321 = vmatpush.msrb.mxu0 %v188_v10 }
  0x3a   : > { %341 = vmatpush.msrb.mxu1 %v236_v11 }
  0x3b   : > { %322 = vmatpush.msrb.mxu0 %v185_v12 }
  0x3c   : > { %342 = vmatpush.msrb.mxu1 %v233_v13 }
  0x3d   : > { %323 = vmatpush.msrb.mxu0 %v182_v14 }
  0x3e   : > { %343 = vmatpush.msrb.mxu1 %v230_v15 }
  0x3f   : > { %324 = vmatpush.msrb.mxu0 %v179_v16 }
  0x40   : > { %344 = vmatpush.msrb.mxu1 %v227_v17 }
  0x41   : > { %325 = vmatpush.msrb.mxu0 %v176_v18 }
  0x42   : > { %345 = vmatpush.msrb.mxu1 %v224_v19 }
  0x43   : > { %326 = vmatpush.msrb.mxu0 %v173_v20 }
  0x44   : > { %346 = vmatpush.msrb.mxu1 %v221_v21 }
  0x45   : > { %327 = vmatpush.msrb.mxu0 %v170_v22 }
  0x46   : > { %347 = vmatpush.msrb.mxu1 %v218_v23 }
  0x47   : > { %328 = vmatpush.msrb.mxu0 %v167_v30 }
  0x48   : > { %348 = vmatpush.msrb.mxu1 %v215_v31 }
  0x49   : > { %329 = vmatpush.msrb.mxu0 %v164_v32 }
  0x4a   : > { %349 = vmatpush.msrb.mxu1 %v212_v33 }
  0x4b   : > { %330 = vmatpush.msrb.mxu0 %v161_v34 }
  0x4c   : > { %350 = vmatpush.msrb.mxu1 %v209_v35 }
  0x4d   : > { %331 = vmatpush.msrb.mxu0 %v158_v36 }
  0x4e   : > { %351 = vmatpush.msrb.mxu1 %v206_v37 }
  0x4f   : > { %332 = vmatpush.msrb.mxu0 %v155_v38 }
  0x50   : > { %352 = vmatpush.msrb.mxu1 %v203_v39 }
  0x51   : > { %333 = vmatpush.msrb.mxu0 %v152_v40 }
  0x52   : > { %353 = vmatpush.msrb.mxu1 %v200_v41 }
  0x53   : > { %334 = vmatpush.msrb.mxu0 %v149_v42 }
  0x54   : > { %354 = vmatpush.msrb.mxu1 %v197_v43 }
  0x55   : > { %335 = vmatpush.msrb.mxu0 %v146_v44 }
  0x56   : > { %355 = vmatpush.msrb.mxu1 %v194_v45  ;;  %336 = vmatmul.f32.vlgmr.msrb.gmra.mxu0 %v883_v60 }
  0x57   : > { %356 = vmatmul.f32.vlgmr.msrb.gmra.mxu1 %v885_v61 }
  0xb3   : > { %v257_v2 = vpop.f32.mrf.mxu0 }
  0xb4   : > { %v277_v3 = vpop.f32.mrf.mxu1 }
  0xb5   : > { %v278_v7 = vadd.f32 %v277_v3, %v257_v2 }
  0xb6   : > { %v297_v4 = vpop.f32.mrf.mxu2 }
  0xb7   : > { %v317_v5 = vpop.f32.mrf.mxu3 }
  0xb8   : > { %v318_v6 = vadd.f32 %v317_v5, %v297_v4 }
  0xba   : > { %375 = vmatpush.xpose.msrb.mxu2 %v318_v6 }
  0xbd   : > { %376 = vmatmul.f32.vlgmr.msrb.gmra.mxu2 %v278_v7 }
  0xd3   : > { %v337_v51 = vpop.f32.mrf.mxu0 }
  0xd4   : > { %v357_v52 = vpop.f32.mrf.mxu1 }
  0xd5   : > { %v358_v53 = vadd.f32 %v357_v52, %v337_v51 }
  0xd7   : > { %429 = vmatpush.msrb.mxu3 %v358_v53 }
 0x140   : > { %v377_v27 = vpop.f32.mrf.mxu2 }
 0x141   : > { %v385_v28 = vsel %vm384_vm0, %v377_v27, -inf }
 0x142   : > { %v387_v29 = vsel %vm386_vm1, %v385_v28, -inf }
 0x143   : > { %388 = vmax.xlane.f32.xlu0 %v387_v29 }
 0x1b6   : > { %v389_v46 = vpop.xlane.xlu0 %388 }
 0x1b7   : > { %v390_v47 = vsub.f32 %v385_v28, %v389_v46 }
 0x1b9   : > { %v391_v48 = vmul.f32 1.442695, %v390_v47 }
 0x1bb   : > { %562 = vpow2.f32 %v391_v48 }
 0x1c1   : > { %v563_v49 = vpop.eup %562 }
 0x1c2   : > { %v393_v50 = vsel %vm386_vm1, %v563_v49, 0.0 }
 0x1c3   : > { %394 = vadd.xlane.f32.xlu0 %v393_v50 }
 0x236   : > { %v395_v54 = vpop.xlane.xlu0 %394 }
 0x237   : > { %564 = vrcp.f32 %v395_v54  ;;  %v407_v58 = vand.u32 2147483648, %v395_v54  ;;  %v405_v60 = vand.u32 2147483647, %v395_v54  ;;  %vm401_vm3 = vweird.f32 %v395_v54 }
 0x239   : > { %v408_v62 = vor.u32 1.1754944e-38, %v407_v58  ;;  %vm406_vm5 = vcmp.eq.f32.partialorder %v405_v60, 8.507059e+37 }
 0x23d   : > { %v565_v55 = vpop.eup %564 }
 0x23e   : > { %v397_v56 = vmul.f32 %v565_v55, %v395_v54  ;;  %vm402_vm2 = vweird.f32 %v565_v55 }
 0x23f   : > { %vm403_vm4 = vmor %vm401_vm3, %vm402_vm2 }
 0x240   : > { %v398_v57 = vsub.f32 1.0, %v397_v56 }
 0x242   : > { %v399_v59 = vmul.f32 %v565_v55, %v398_v57 }
 0x244   : > { %v400_v61 = vadd.f32 %v565_v55, %v399_v59 }
 0x246   : > { %v404_v63 = vsel %vm403_vm4, %v565_v55, %v400_v61 }
 0x247   : > { %v409_v0 = vsel %vm406_vm5, %v408_v62, %v404_v63 }
 0x248   : > { %v410_v1 = vmul.f32 %v563_v49, %v409_v0 }
 0x24a   : > { %517 = vmatmul.msk.f32.vlgmr.msrb.gmra.mxu3 %vm386_vm1, %v410_v1 }
 0x2cd   : > { %v431_v2 = vpop.f32.mrf.mxu3 }
 0x2ce   : > { %434 = vst [vmem:[%s136_s7] sm:$0xff] %v431_v2 }
 0x2cf   : > { %593 = shalt.err (!%p590_p3)
}
 0x2d0   : > { %523 = dma.vmem_to_hbm [thread:$0]  (%p683_p5), %s449_s8, 128, %s451_s29, %s436_s14  }
 0x2d1 PF: > { %p529_p4 = scmp.ge.s32.totalorder %s628_s12, 2  ;;  %s462_s25 = sand.u32 1, %s616_s9  }
 0x2d2   : > { %s463_s26 = scalar_lea.sflag [#allocation3], %s462_s25 }
 0x2d3   : > { %p526_p7 = pnand %p529_p4, %p687_p6 }
 0x2d5   : > { %p527_p8 = pneg %p526_p7 }
 0x2d7   : > { %611 = dma.done.wait (%p527_p8), %s463_s26, 128  }
 0x2d8   : > { %613 = vsyncadd (%p527_p8), %s463_s26, 4294967168  ;;  %p12_p9 = scmp.ge.s32.totalorder %s670_s15, 4   ;;  %s1041_s9 = smov %s620_s10 }
 0x2d9   : > { %s1042_s10 = smov %s624_s11  ;;  %s1043_s11 = smov %s681_s18 }
 0x2da   : > { %s1044_s12 = smov %s670_s15  ;;  %14 = sbr.rel (!%p12_p9) target bundleno = 3 (0x3), region = 63 }
 0x2df   :  { %469 = vsyncpa [#allocation3], 1 }
 0x2e0   :  { %471 = vsyncpa [#allocation3 + $0x1], 1 }

</bundles_post_ra>
